<compile_context>
chip_gen: v7x
topology: tpu7x:2x2x1
jax: 0.10.0
libtpu: 0.0.40
codegen_flags: <defaults>
</compile_context>

<pallas_src>
import jax
import jax.numpy as jnp
from jax.experimental import pallas as pl
from jax.experimental.pallas import tpu as pltpu

_LN2 = 0.6931471805599453


def _log_cosh_kernel(x_ref, o_ref):
    # Compute in f32 regardless of storage dtype (v5e has no bf16 VPU/EUP path).
    x = x_ref[...].astype(jnp.float32)
    ax = jnp.abs(x)
    # Stable: log(cosh(x)) = |x| + log(1 + exp(-2|x|)) - log(2).
    # exp argument is <= 0, so no overflow for any input magnitude.
    y = ax + jnp.log(1.0 + jnp.exp(-2.0 * ax)) - _LN2
    o_ref[...] = y.astype(o_ref.dtype)


def _vmem_capacity_bytes():
    try:
        return int(pltpu.get_tpu_info().vmem_capacity_bytes)
    except Exception:
        return 64 << 20  # conservative: v7x has 64 MiB VMEM per TensorCore


def integral_tanh(x):
    """Elementwise log(cosh(x)) via a lane-dense Pallas TPU kernel."""
    orig_shape = x.shape
    orig_dtype = x.dtype
    n = x.size
    if n == 0:
        return x

    itemsize = jnp.dtype(orig_dtype).itemsize

    # ---- Layout: flatten to a lane-dense (R, C) 2-D shape ------------------
    # Elementwise op => layout is free.  Pick wide columns (multiple of 128)
    # that divide the total element count -> no padding, no extra HBM pass.
    C = None
    for cand in (4096, 2048, 1024, 512, 256, 128):
        if n % cand == 0:
            C = cand
            break
    if C is None:
        # Ragged total: pad the flat vector by fewer than 128 elements.
        C = 128
        R = pl.cdiv(n, C)
        pad = R * C - n
        x2 = jnp.pad(x.reshape(-1), (0, pad)).reshape(R, C)
    else:
        R = n // C
        pad = 0
        x2 = x.reshape(R, C)

    # ---- Tile selection (generation-aware VMEM budget) ----------------------
    vmem_cap = _vmem_capacity_bytes()
    budget = int(vmem_cap * 0.4)               # in + out, each double-buffered
    row_align = max(8, 32 // itemsize)         # 8 for f32, 16 for bf16, 32 for 8-bit
    max_rows = max(row_align,
                   (budget // (4 * C * itemsize)) // row_align * row_align)
    tr_cap = min(512, max_rows)
    if R <= tr_cap:
        tr = R                                  # full-dim row block: always legal
    else:
        tr = tr_cap                             # multiple of row_align; ragged edge OK

    tc = C
    grid_r = pl.cdiv(R, tr)
    if grid_r == 1 and C >= 256:
        tc = C // 2                             # keep >=2 grid blocks for megacore
    grid = (grid_r, C // tc)

    tile_bytes = tr * tc * itemsize
    needed = 4 * tile_bytes + (4 << 20)         # 2 bufs x (in + out) + slack
    vmem_limit = min(int(vmem_cap * 0.75), max(needed, 32 << 20))
    vmem_limit = max(vmem_limit, needed)

    out = pl.pallas_call(
        _log_cosh_kernel,
        out_shape=jax.ShapeDtypeStruct(x2.shape, orig_dtype),
        grid_spec=pltpu.PrefetchScalarGridSpec(
            num_scalar_prefetch=0,
            grid=grid,
            in_specs=[pl.BlockSpec((tr, tc), lambda i, j: (i, j))],
            out_specs=pl.BlockSpec((tr, tc), lambda i, j: (i, j)),
        ),
        input_output_aliases={0: 0},            # donate input buffer
        compiler_params=pltpu.CompilerParams(
            dimension_semantics=("parallel", "parallel"),
            vmem_limit_bytes=vmem_limit,
        ),
    )(x2)

    if pad:
        out = out.reshape(-1)[:n]
    return out.reshape(orig_shape)


if __name__ == "__main__":
    key = jax.random.PRNGKey(0)
    # Shape analogous to an NCHW activation tensor: batch=2, channels=4, 16x16.
    x = jax.random.normal(key, (2, 4, 16, 16), dtype=jnp.float32)

    y = integral_tanh(x)
    jax.block_until_ready(y)

    # Reference check against plain JAX (torch.log(torch.cosh(x)) equivalent).
    y_ref = jnp.log(jnp.cosh(x))
    assert y.shape == x.shape and y.dtype == x.dtype
    assert jnp.allclose(y, y_ref, atol=1e-5, rtol=1e-5), float(
        jnp.max(jnp.abs(y - y_ref))
    )

    print("KERNEL_OK")
</pallas_src>

<mosaic_0001>
module attributes {stable_mosaic.version = 11 : i64} {
  func.func @_log_cosh_kernel(%arg0: i32, %arg1: i32, %arg2: memref<1x1024xf32, #tpu.memory_space<vmem>>, %arg3: memref<1x1024xf32, #tpu.memory_space<vmem>>) attributes {dimension_semantics = [#tpu.dimension_semantics<parallel>, #tpu.dimension_semantics<parallel>], iteration_bounds = array<i64: 1, 2>, scalar_prefetch = 0 : i64, scratch_operands = 0 : i64, tpu.core_type = #tpu.core_type<tc>, window_params = [{transform_indices = @transform_0, window_bounds = array<i64: 1, 1024>}, {transform_indices = @transform_1, window_bounds = array<i64: 1, 1024>}]} {
    %c0 = arith.constant 0 : index
    %c0_0 = arith.constant 0 : index
    %0 = vector.load %arg2[%c0, %c0_0] : memref<1x1024xf32, #tpu.memory_space<vmem>>, vector<1x1024xf32>
    %1 = math.absf %0 : vector<1x1024xf32>
    %cst = arith.constant -2.000000e+00 : f32
    %2 = vector.broadcast %cst : f32 to vector<1x1024xf32>
    %3 = arith.mulf %2, %1 : vector<1x1024xf32>
    %4 = math.exp %3 : vector<1x1024xf32>
    %cst_1 = arith.constant 1.000000e+00 : f32
    %5 = vector.broadcast %cst_1 : f32 to vector<1x1024xf32>
    %6 = arith.addf %5, %4 : vector<1x1024xf32>
    %7 = math.log %6 : vector<1x1024xf32>
    %8 = arith.addf %1, %7 : vector<1x1024xf32>
    %cst_2 = arith.constant 0.693147182 : f32
    %9 = vector.broadcast %cst_2 : f32 to vector<1x1024xf32>
    %10 = arith.subf %8, %9 : vector<1x1024xf32>
    %c0_3 = arith.constant 0 : index
    %c0_4 = arith.constant 0 : index
    %11 = vector.load %arg3[%c0_3, %c0_4] : memref<1x1024xf32, #tpu.memory_space<vmem>>, vector<1x1024xf32>
    tpu.vector_store %arg3[%c0_3, %c0_4], %10 {strides = array<i32>} : memref<1x1024xf32, #tpu.memory_space<vmem>>, vector<1x1024xf32>,
    return
  }
  func.func @transform_0(%arg0: i32, %arg1: i32) -> (i32, i32) {
    %c0_i32 = arith.constant 0 : i32
    return %arg0, %arg1 : i32, i32
  }
  func.func @transform_1(%arg0: i32, %arg1: i32) -> (i32, i32) {
    %c0_i32 = arith.constant 0 : i32
    return %arg0, %arg1 : i32, i32
  }
}

</mosaic_0001>

<bundles_post_ra>
// kernel: tpu_custom_call.1
= control target key start
LH: loop header
LB: loop body
LE: loop exit
PB: predicated region body
PF: predicated region fallthrough
CT: control target
= control target key end

     0   :  { %6 = vsyncpa [#allocation3], 0  ;;  %s647_s0 = inlined_call_operand.hbm [shape: f32[1,2048], index: 0, kind: input, shape index: {}, may-alias: {0,1}]   ;;  %s648_s1 = inlined_call_operand.hbm [shape: f32[1,2048], index: 1, kind: output, shape index: {}, may-alias: {0,1}]  }
   0x1   :  { %8 = vsyncpa [#allocation3 + $0x1], 0 }
   0x2   :  { %9 = vsyncpa [#allocation4], 0 }
   0x3   :  { %11 = vsyncpa [#allocation4 + $0x1], 0  ;;  %s475_s6 = smov 0   ;;  %s477_s7 = smov 0  }
   0x4   :  { %s479_s8 = smov 0   ;;  %s481_s9 = smov 0  }
   0x5   :  { %s483_s10 = smov 0   ;;  %s485_s11 = smov 0  }
   0x6 LB: > { %s265_s12 = sadd.s32 4294967295, %s461_s11   ;;  %s266_s13 = sadd.s32 4294967294, %s461_s11   ;;  %s461_s11 = sphi %s485_s11, %s17_s11   ;;  %s457_s10 = sphi %s483_s10, %s664_s10   ;;  %s453_s9 = sphi %s481_s9, %s663_s9   ;;  %s449_s8 = sphi %s479_s8, %s662_s8   ;;  %s445_s7 = sphi %s477_s7, %s661_s7   ;;  %s441_s6 = sphi %s475_s6, %s660_s6  }
   0x7   : > { %s26_s14 = sadd.s32 1, %s457_s10  ;;  %s38_s15 = sadd.s32 1, %s449_s8 }
   0x8   : > { %p27_p0 = scmp.ge.s32.totalorder %s26_s14, 2  ;;  %p45_p1 = scmp.ne.s32.totalorder %s449_s8, %s445_s7 }
   0x9   : > { %p46_p2 = scmp.eq.s32.totalorder %s461_s11, 0  ;;  %p51_p3 = scmp.ne.s32.totalorder %s445_s7, %s441_s6 }
   0xa   : > { %s666_s14 = smov (%p27_p0, %s26_s14), 0  ;;  %p52_p5 = scmp.eq.s32.totalorder %s265_s12, 0 }
   0xb   : > { %p516_p4 = por %p46_p2, %p45_p1  ;;  %s34_s17 = ssub.s32 %s457_s10, %s666_s14 }
   0xc   : > { %p77_p6 = scmp.eq.s32.totalorder %s265_s12, 1  ;;  %p36_p7 = scmp.eq.s32.totalorder %s34_s17, 0 }
   0xd   : > { %p522_p8 = por %p52_p5, %p51_p3  ;;  %p83_p10 = scmp.eq.s32.totalorder %s266_s13, 1 }
   0xe   : > { %p526_p9 = por %p77_p6, %p45_p1  ;;  %p295_p13 = scmp.lt.s32.totalorder %s461_s11, 2 }
   0xf   : > { %s531_s20 = scalar_select %p36_p7, %s449_s8, %s38_s15  }
  0x10   : > { %s652_s19 = scalar_select %p526_p9, 1, 0 }
  0x11   : > { %p533_p11 = por %p83_p10, %p51_p3  ;;  %s103_s22 = sand.u32 1, %s449_s8  }
  0x12   : > { %s269_s23 = sshll.u32 %s103_s22, 3  ;;  %s281_s24 = sshll.u32 %s457_s10, 7 }
  0x13   : > { %s653_s21 = scalar_select %p533_p11, 1, 0 }
  0x14   : > { %s544_s27 = scalar_lea.hbm %s647_s0, %s281_s24  ;;  %s107_s28 = scalar_lea.vmem [#allocation2], %s269_s23 }
  0x15   : > { %s117_s29 = sshll.u32 %s107_s28, 4  ;;  %p550_p0 = pnand %p295_p13, %p516_p4  ;;  %s546_s29 = int_to_ptr.vmem [resolvable:$true] %s117_s29 }
  0x16   : > { %s104_s2 = scalar_lea.sflag [#allocation3], %s103_s22  ;;  %s349_s3 = scalar_lea.hbm %s544_s27, 128 }
  0x17   : > { %p350_p3 = scmp.ne.s32.totalorder %s544_s27, %s349_s3  ;;  %p351_p5 = pneg %p550_p0 }
  0x18   : > { %s354_s12 = scalar_lea.hbm %s647_s0, 256  ;;  %p355_p4 = scmp.lt.u32.totalorder %s544_s27, %s647_s0 }
  0x19   : > { %p352_p6 = pnand %p351_p5, %p350_p3  ;;  %p356_p10 = scmp.lt.u32.totalorder %s354_s12, %s349_s3 }
  0x1a   : > { %p358_p12 = scmp.lt.u32.totalorder %s349_s3, %s544_s27 }
  0x1b   : > { %p353_p7 = pneg %p352_p6  ;;  %p357_p13 = por %p356_p10, %p355_p4 }
  0x1d   : > { %p359_p1 = por %p358_p12, %p357_p13 }
  0x1f   : > { %p360_p2 = pnand %p359_p1, %p353_p7 }
  0x21   : > { %363 = shalt.err (!%p360_p2)
}
  0x22   : > { %s364_s16 = scalar_lea.vmem %s546_s29, 128  ;;  %s463_s17 = smov [#allocation2]  }
  0x23   : > { %p365_p3 = scmp.ne.s32.totalorder %s546_s29, %s364_s16  ;;  %s369_s22 = sshll.u32 %s463_s17, 4  ;;  %s370_s22 = int_to_ptr.vmem [resolvable:$false] %s369_s22 }
  0x24   : > { %s371_s23 = scalar_lea.vmem %s370_s22, 256  ;;  %p372_p9 = scmp.lt.s32.totalorder %s546_s29, %s370_s22 }
  0x25   : > { %p367_p6 = pnand %p365_p3, %p351_p5  ;;  %p373_p4 = scmp.lt.s32.totalorder %s371_s23, %s364_s16 }
  0x27   : > { %p368_p11 = pneg %p367_p6  ;;  %p374_p10 = por %p373_p4, %p372_p9 }
  0x29   : > { %p375_p12 = pnand %p374_p10, %p368_p11 }
  0x2b   : > { %378 = shalt.err (!%p375_p12)
}
  0x2c   : > { %290 = dma.hbm_to_vmem [thread:$0]  (!%p550_p0), %s544_s27, 128, %s546_s29, %s104_s2  }
  0x2d   : > { %p655_p1 = scmp.lt.s32.totalorder %s461_s11, 3  ;;  %p656_p2 = scmp.ge.s32.totalorder %s461_s11, 1 }
  0x2f   : > { %p123_p5 = pnand %p656_p2, %p655_p1 }
  0x30   : > { %s586_s24 = sand.u32 (!%p123_p5), 1, %s445_s7  }
  0x31   : > { %126 = sbr.rel (%p123_p5) target bundleno = 108 (0x6c), region = 24  ;;  %s273_s25 = sshll.u32 (!%p123_p5), %s586_s24, 3 }
  0x32   : > { %s129_s26 = scalar_lea.sflag (!%p123_p5), [#allocation3], %s586_s24  ;;  %s132_s28 = scalar_lea.vmem (!%p123_p5), [#allocation2], %s273_s25 }
  0x38   : > { %432 = dma.done.wait (%p522_p8), %s129_s26, 128  }
  0x39   : > { %434 = vsyncadd (%p522_p8), %s129_s26, 4294967168  ;;  %v153_v0 = vld [vmem:[%s132_s28] sm:$0xff]  ;;  %s150_s27 = scalar_lea.vmem [#allocation5], %s273_s25  ;;  %s282_s30 = sshll.u32 %s453_s9, 7 }
  0x3a   : > { %v154_v1 = vand.u32 2147483647, %v153_v0  ;;  %s181_s29 = sshll.u32 %s150_s27, 4  ;;  %s600_s3 = scalar_lea.hbm %s648_s1, %s282_s30  ;;  %s595_s29 = int_to_ptr.vmem [resolvable:$true] %s181_s29 }
  0x3b   : > { %s165_s4 = scalar_lea.sflag [#allocation4], %s586_s24  ;;  %s379_s5 = scalar_lea.vmem %s595_s29, 128 }
  0x3c   : > { %v155_v2 = vmul.f32 -2.0, %v154_v1  ;;  %p380_p8 = scmp.ne.s32.totalorder %s595_s29, %s379_s5  ;;  %p657_p9 = scmp.ne.s32.totalorder %s652_s19, 0 }
  0x3d   : > { %s464_s9 = smov [#allocation5]  }
  0x3e   : > { %v156_v3 = vmul.f32 1.442695, %v155_v2  ;;  %p381_p11 = pnand %p380_p8, %p657_p9  ;;  %s383_s12 = sshll.u32 %s464_s9, 4  ;;  %s384_s12 = int_to_ptr.vmem [resolvable:$false] %s383_s12 }
  0x3f   : > { %s385_s13 = scalar_lea.vmem %s384_s12, 256  ;;  %p386_p7 = scmp.lt.s32.totalorder %s595_s29, %s384_s12 }
  0x40   : > { %345 = vpow2.f32 %v156_v3  ;;  %p382_p0 = pneg %p381_p11  ;;  %p387_p13 = scmp.lt.s32.totalorder %s385_s13, %s379_s5 }
  0x42   : > { %p388_p3 = por %p387_p13, %p386_p7 }
  0x44   : > { %p389_p6 = pnand %p388_p3, %p382_p0 }
  0x4a   : > { %v346_v4 = vpop.eup %345 }
  0x4b   : > { %v158_v5 = vadd.f32 1.0, %v346_v4 }
  0x4d   : > { %347 = vlog2.f32 %v158_v5 }
  0x57   : > { %v348_v6 = vpop.eup %347 }
  0x58   : > { %v160_v7 = vmul.f32 0.6931472, %v348_v6 }
  0x5a   : > { %v161_v8 = vadd.f32 %v160_v7, %v154_v1 }
  0x5c   : > { %v275_v9 = vadd.f32 -0.6931472, %v161_v8 }
  0x5e   : > { %163 = vst [vmem:[%s150_s27] sm:$0xff] %v275_v9 }
  0x5f   : > { %392 = shalt.err (!%p389_p6)
}
  0x60   : > { %s393_s15 = scalar_lea.hbm %s600_s3, 128  ;;  %s397_s22 = scalar_lea.hbm %s648_s1, 256 }
  0x61   : > { %p394_p4 = scmp.ne.s32.totalorder %s600_s3, %s393_s15  ;;  %p398_p1 = scmp.lt.u32.totalorder %s600_s3, %s648_s1 }
  0x62   : > { %p399_p2 = scmp.lt.u32.totalorder %s397_s22, %s393_s15  ;;  %p401_p8 = scmp.lt.u32.totalorder %s393_s15, %s600_s3 }
  0x63   : > { %p395_p10 = pnand %p394_p4, %p657_p9 }
  0x64   : > { %p400_p5 = por %p399_p2, %p398_p1 }
  0x65   : > { %p396_p12 = pneg %p395_p10 }
  0x66   : > { %p402_p11 = por %p401_p8, %p400_p5 }
  0x68   : > { %p403_p0 = pnand %p402_p11, %p396_p12 }
  0x6a   : > { %406 = shalt.err (!%p403_p0)
}
  0x6b   : > { %285 = dma.vmem_to_hbm [thread:$0]  (%p657_p9), %s595_s29, 128, %s600_s3, %s165_s4  }
  0x6c PF: > { %s193_s25 = sand.u32 1, %s441_s6   ;;  %p658_p7 = scmp.ne.s32.totalorder %s653_s21, 0 }
  0x6d   : > { %p659_p13 = scmp.ge.s32.totalorder %s461_s11, 2  ;;  %s194_s26 = scalar_lea.sflag [#allocation4], %s193_s25 }
  0x6f   : > { %p292_p3 = pnand %p659_p13, %p658_p7 }
  0x71   : > { %436 = dma.done.wait (!%p292_p3), %s194_s26, 128  }
  0x72   : > { %438 = vsyncadd (!%p292_p3), %s194_s26, 4294967168  ;;  %s17_s11 = sadd.s32 1, %s461_s11   ;;  %s660_s6 = smov %s445_s7 }
  0x73   : > { %p14_p6 = scmp.ge.s32.totalorder %s17_s11, 4   ;;  %s661_s7 = smov %s449_s8 }
  0x74   : > { %s662_s8 = smov %s531_s20  ;;  %s663_s9 = smov %s457_s10 }
  0x75   : > { %s664_s10 = smov %s666_s14  ;;  %16 = sbr.rel (!%p14_p6) target bundleno = 6 (0x6), region = 69 }
  0x7c   :  { %199 = vsyncpa [#allocation3], 1 }
  0x7d   :  { %201 = vsyncpa [#allocation3 + $0x1], 1 }
  0x7e   :  { %202 = vsyncpa [#allocation4], 1 }
  0x7f   :  { %204 = vsyncpa [#allocation4 + $0x1], 1 }

</bundles_post_ra>
